<compile_context>
chip_gen: v5e
topology: v5e:2x2
jax: 0.10.0
libtpu: 0.0.40
codegen_flags: <defaults>
</compile_context>

<pallas_src>
import functools
import math

import jax
import jax.numpy as jnp
from jax.experimental import pallas as pl
from jax.experimental.pallas import tpu as pltpu

LN_EPS = 1e-5
MATMUL_WEIGHTS = ("wq", "wk", "wv", "wo", "w1", "w2")


def _layernorm_f32(x, gamma, beta):
    mu = jnp.mean(x, axis=-1, keepdims=True)
    var = jnp.mean((x - mu) ** 2, axis=-1, keepdims=True)
    return (x - mu) * jax.lax.rsqrt(var + LN_EPS) * gamma + beta


def _gelu_exact(x):
    # PyTorch nn.GELU() default (exact, erf-based).
    return 0.5 * x * (1.0 + jax.lax.erf(x * (1.0 / math.sqrt(2.0))))


def _encoder_block_kernel(
    x_ref,
    g1_ref, bt1_ref,
    wq_ref, wk_ref, wv_ref, bq_ref, bk_ref, bv_ref,
    wo_ref, bo_ref,
    g2_ref, bt2_ref,
    w1_ref, bm1_ref, w2_ref, bm2_ref,
    o_ref,
    attn_scratch,           # (S, E) f32 VMEM scratch for concatenated head outputs
    *, num_heads,
):
    x = x_ref[0].astype(jnp.float32)          # (S, E) residual stream in f32
    S, E = x.shape
    D = E // num_heads
    scale = 1.0 / math.sqrt(D)

    # ---- hoist parameter reads once (JAX does not CSE broadcast_in_dim) ----
    g1, bt1 = g1_ref[...], bt1_ref[...]
    g2, bt2 = g2_ref[...], bt2_ref[...]
    bq, bk, bv = bq_ref[...], bk_ref[...], bv_ref[...]
    bo, bm1, bm2 = bo_ref[...], bm1_ref[...], bm2_ref[...]
    wq, wk, wv, wo = wq_ref[...], wk_ref[...], wv_ref[...], wo_ref[...]   # bf16
    w1, w2 = w1_ref[...], w2_ref[...]                                     # bf16

    # ---- LayerNorm 1 (f32 on the VPU) ----
    y = _layernorm_f32(x, g1, bt1)
    y_lo = y.astype(jnp.bfloat16)

    # ---- QKV projections: bf16 operands, f32 accumulation on the MXU ----
    q = jnp.dot(y_lo, wq, preferred_element_type=jnp.float32) + bq
    k = jnp.dot(y_lo, wk, preferred_element_type=jnp.float32) + bk
    v = jnp.dot(y_lo, wv, preferred_element_type=jnp.float32) + bv

    # Fold the 1/sqrt(D) softmax scale into q once (O(S*E) not O(H*S*S)), then
    # cast q/k/v to bf16 ONCE outside the head loop so the score and P@V
    # matmuls both use bf16 operands (full-rate MXU).
    q_lo = (q * scale).astype(jnp.bfloat16)
    k_lo = k.astype(jnp.bfloat16)
    v_lo = v.astype(jnp.bfloat16)

    # ---- per-head attention, deferred softmax normalization ----
    # Writes land in lane slices of a persistent VMEM scratch: bounds the live
    # range of each head's temporaries and avoids an H-way lane concat.
    nt_dims = (((1,), (1,)), ((), ()))        # q @ k^T without materializing k.T
    for h in range(num_heads):
        sl = slice(h * D, (h + 1) * D)
        s = jax.lax.dot_general(q_lo[:, sl], k_lo[:, sl], nt_dims,
                                preferred_element_type=jnp.float32)      # (S, S) f32
        p = jnp.exp(s - jnp.max(s, axis=-1, keepdims=True))              # f32
        l = jnp.sum(p, axis=-1, keepdims=True)                           # (S, 1)
        oh = jnp.dot(p.astype(jnp.bfloat16), v_lo[:, sl],
                     preferred_element_type=jnp.float32)                 # (S, D)
        # normalize the (S, D) output instead of the (S, S) probs; approx
        # reciprocal runs on the otherwise-idle EUP slot.
        attn_scratch[:, sl] = oh * pl.reciprocal(l, approx=True)

    # ---- output projection + residual ----
    attn = jnp.dot(attn_scratch[...].astype(jnp.bfloat16), wo,
                   preferred_element_type=jnp.float32) + bo
    x1 = x + attn

    # ---- LayerNorm 2 + MLP + residual ----
    y2 = _layernorm_f32(x1, g2, bt2)
    h1 = jnp.dot(y2.astype(jnp.bfloat16), w1,
                 preferred_element_type=jnp.float32) + bm1
    h1 = _gelu_exact(h1)                                                 # f32 GELU
    h2 = jnp.dot(h1.astype(jnp.bfloat16), w2,
                 preferred_element_type=jnp.float32) + bm2

    o_ref[0] = (x1 + h2).astype(o_ref.dtype)


def _pick_vmem_limit_bytes():
    """Generation-aware scoped-VMEM limit (v5e/v6e: 128 MiB, v7x: 64 MiB)."""
    cap = None
    try:
        info = pltpu.get_tpu_info()
        cap = getattr(info, "vmem_capacity_bytes", None)
    except Exception:
        cap = None
    if not cap:
        cap = 64 * 1024 * 1024          # conservative fallback (v7x-sized)
    # 75% of capacity, leave headroom for compiler-internal scratch.
    return min(int(cap * 3 // 4), 96 * 1024 * 1024)


def self_attention_encoder_block(x, params, num_heads):
    """x: (B, S, E) float32.

    params: dict of pre-transposed weights (y @ W layout).  Matmul weights
    (wq/wk/wv/wo/w1/w2) should already be bf16 (cast once at model-load time);
    biases and LayerNorm params stay f32.
    """
    B, S, E = x.shape

    param_order = [
        "g1", "bt1",
        "wq", "wk", "wv", "bq", "bk", "bv",
        "wo", "bo",
        "g2", "bt2",
        "w1", "bm1", "w2", "bm2",
    ]
    param_arrays = [params[n] for n in param_order]

    def resident_spec(arr):
        # Whole (2-D) parameter resident every grid step (constant index_map
        # -> fetched once, kept across the batch grid).
        return pl.BlockSpec(arr.shape, lambda b: (0, 0))

    in_specs = [pl.BlockSpec((1, S, E), lambda b: (b, 0, 0))] + [
        resident_spec(a) for a in param_arrays
    ]
    out_spec = pl.BlockSpec((1, S, E), lambda b: (b, 0, 0))

    kernel = functools.partial(_encoder_block_kernel, num_heads=num_heads)

    # Advisory cost estimate so XLA can overlap the weight HBM fetch with
    # surrounding work when this block sits inside a larger jit.
    matmul_flops = 2 * B * S * E * E * 12 + 4 * B * S * S * E
    transcendentals = B * num_heads * S * S + B * S * 4 * E     # exp + erf
    weight_bytes = sum(int(a.size) * a.dtype.itemsize for a in param_arrays)
    bytes_accessed = 2 * B * S * E * 4 + weight_bytes

    return pl.pallas_call(
        kernel,
        out_shape=jax.ShapeDtypeStruct((B, S, E), x.dtype),
        grid=(B,),
        in_specs=in_specs,
        out_specs=out_spec,
        scratch_shapes=[pltpu.VMEM((S, E), jnp.float32)],      # attn head slab
        compiler_params=pltpu.CompilerParams(
            # batch axis is independent -> both v7x TensorCores get work.
            dimension_semantics=("parallel",),
            vmem_limit_bytes=_pick_vmem_limit_bytes(),
        ),
        cost_estimate=pl.CostEstimate(
            flops=matmul_flops,
            transcendentals=transcendentals,
            bytes_accessed=bytes_accessed,
        ),
    )(x, *param_arrays)


# -------------------- plain-JAX reference for verification --------------------
def reference_block(x, p, num_heads):
    B, S, E = x.shape
    D = E // num_heads
    hp = jax.lax.Precision.HIGHEST

    y = _layernorm_f32(x, p["g1"], p["bt1"])
    q = jnp.einsum("bse,ef->bsf", y, p["wq"], precision=hp) + p["bq"]
    k = jnp.einsum("bse,ef->bsf", y, p["wk"], precision=hp) + p["bk"]
    v = jnp.einsum("bse,ef->bsf", y, p["wv"], precision=hp) + p["bv"]
    q = q.reshape(B, S, num_heads, D)
    k = k.reshape(B, S, num_heads, D)
    v = v.reshape(B, S, num_heads, D)
    s = jnp.einsum("bqhd,bkhd->bhqk", q, k, precision=hp) / math.sqrt(D)
    a = jax.nn.softmax(s, axis=-1)
    o = jnp.einsum("bhqk,bkhd->bqhd", a, v, precision=hp).reshape(B, S, E)
    attn = jnp.einsum("bse,ef->bsf", o, p["wo"], precision=hp) + p["bo"]
    x1 = x + attn
    y2 = _layernorm_f32(x1, p["g2"], p["bt2"])
    h = _gelu_exact(jnp.einsum("bse,ef->bsf", y2, p["w1"], precision=hp) + p["bm1"])
    return x1 + jnp.einsum("bsf,fe->bse", h, p["w2"], precision=hp) + p["bm2"]


# -------------------- deterministic parameter init --------------------
def make_params(key, E):
    ks = jax.random.split(key, 12)
    n = lambda k, shape, s=0.05: (jax.random.normal(k, shape, jnp.float32) * s)
    params = {
        # LayerNorm 1
        "g1": 1.0 + n(ks[0], (1, E), 0.01),
        "bt1": n(ks[1], (1, E), 0.01),
        # MHA in-projections (already transposed: y @ W)
        "wq": n(ks[2], (E, E)),
        "wk": n(ks[3], (E, E)),
        "wv": n(ks[4], (E, E)),
        "bq": n(ks[5], (1, E), 0.01),
        "bk": n(ks[5], (1, E), 0.02),
        "bv": n(ks[5], (1, E), 0.03),
        # MHA out-projection
        "wo": n(ks[6], (E, E)),
        "bo": n(ks[7], (1, E), 0.01),
        # LayerNorm 2
        "g2": 1.0 + n(ks[8], (1, E), 0.01),
        "bt2": n(ks[9], (1, E), 0.01),
        # MLP
        "w1": n(ks[10], (E, 4 * E)),
        "bm1": n(ks[10], (1, 4 * E), 0.01),
        "w2": n(ks[11], (4 * E, E)),
        "bm2": n(ks[11], (1, E), 0.01),
    }
    return params


def prepare_kernel_params(params):
    """One-time (model-load) cast of matmul weights to bf16 for the kernel."""
    return {
        n: (v.astype(jnp.bfloat16) if n in MATMUL_WEIGHTS else v)
        for n, v in params.items()
    }


if __name__ == "__main__":
    B, S, E, H = 2, 8, 32, 4   # batch, seq, embed, heads (head_dim = 8)

    key = jax.random.PRNGKey(0)
    kx, kp = jax.random.split(key)
    x = jax.random.normal(kx, (B, S, E), jnp.float32)
    params = make_params(kp, E)                 # f32 master copy (reference)
    kernel_params = prepare_kernel_params(params)   # bf16 matmul weights, once

    out = self_attention_encoder_block(x, kernel_params, num_heads=H)
    out = jax.block_until_ready(out)

    ref = reference_block(x, params, num_heads=H)
    assert out.shape == (B, S, E)
    # Tolerance accounts for bf16 MXU operands (f32 accumulation, f32 residual
    # stream / LayerNorm / softmax) and the approximate softmax reciprocal.
    assert jnp.allclose(out, ref, rtol=1e-2, atol=1e-2), (
        float(jnp.max(jnp.abs(out - ref)))
    )
    print("KERNEL_OK")
</pallas_src>

<mosaic_0001>
module attributes {stable_mosaic.version = 11 : i64} {
  func.func @_encoder_block_kernel(%arg0: i32, %arg1: memref<1x8x32xf32, #tpu.memory_space<vmem>>, %arg2: memref<1x32xf32, #tpu.memory_space<vmem>>, %arg3: memref<1x32xf32, #tpu.memory_space<vmem>>, %arg4: memref<32x32xbf16, #tpu.memory_space<vmem>>, %arg5: memref<32x32xbf16, #tpu.memory_space<vmem>>, %arg6: memref<32x32xbf16, #tpu.memory_space<vmem>>, %arg7: memref<1x32xf32, #tpu.memory_space<vmem>>, %arg8: memref<1x32xf32, #tpu.memory_space<vmem>>, %arg9: memref<1x32xf32, #tpu.memory_space<vmem>>, %arg10: memref<32x32xbf16, #tpu.memory_space<vmem>>, %arg11: memref<1x32xf32, #tpu.memory_space<vmem>>, %arg12: memref<1x32xf32, #tpu.memory_space<vmem>>, %arg13: memref<1x32xf32, #tpu.memory_space<vmem>>, %arg14: memref<32x128xbf16, #tpu.memory_space<vmem>>, %arg15: memref<1x128xf32, #tpu.memory_space<vmem>>, %arg16: memref<128x32xbf16, #tpu.memory_space<vmem>>, %arg17: memref<1x32xf32, #tpu.memory_space<vmem>>, %arg18: memref<1x8x32xf32, #tpu.memory_space<vmem>>, %arg19: memref<8x32xf32, #tpu.memory_space<vmem>>) attributes {dimension_semantics = [#tpu.dimension_semantics<parallel>], iteration_bounds = array<i64: 2>, scalar_prefetch = 0 : i64, scratch_operands = 1 : i64, tpu.core_type = #tpu.core_type<tc>, window_params = [{transform_indices = @transform_0, window_bounds = array<i64: 1, 8, 32>}, {pipeline_mode = #tpu.pipeline_mode<synchronous>, transform_indices = @transform_1, window_bounds = array<i64: 1, 32>}, {pipeline_mode = #tpu.pipeline_mode<synchronous>, transform_indices = @transform_2, window_bounds = array<i64: 1, 32>}, {pipeline_mode = #tpu.pipeline_mode<synchronous>, transform_indices = @transform_3, window_bounds = array<i64: 32, 32>}, {pipeline_mode = #tpu.pipeline_mode<synchronous>, transform_indices = @transform_4, window_bounds = array<i64: 32, 32>}, {pipeline_mode = #tpu.pipeline_mode<synchronous>, transform_indices = @transform_5, window_bounds = array<i64: 32, 32>}, {pipeline_mode = #tpu.pipeline_mode<synchronous>, transform_indices = @transform_6, window_bounds = array<i64: 1, 32>}, {pipeline_mode = #tpu.pipeline_mode<synchronous>, transform_indices = @transform_7, window_bounds = array<i64: 1, 32>}, {pipeline_mode = #tpu.pipeline_mode<synchronous>, transform_indices = @transform_8, window_bounds = array<i64: 1, 32>}, {pipeline_mode = #tpu.pipeline_mode<synchronous>, transform_indices = @transform_9, window_bounds = array<i64: 32, 32>}, {pipeline_mode = #tpu.pipeline_mode<synchronous>, transform_indices = @transform_10, window_bounds = array<i64: 1, 32>}, {pipeline_mode = #tpu.pipeline_mode<synchronous>, transform_indices = @transform_11, window_bounds = array<i64: 1, 32>}, {pipeline_mode = #tpu.pipeline_mode<synchronous>, transform_indices = @transform_12, window_bounds = array<i64: 1, 32>}, {pipeline_mode = #tpu.pipeline_mode<synchronous>, transform_indices = @transform_13, window_bounds = array<i64: 32, 128>}, {pipeline_mode = #tpu.pipeline_mode<synchronous>, transform_indices = @transform_14, window_bounds = array<i64: 1, 128>}, {pipeline_mode = #tpu.pipeline_mode<synchronous>, transform_indices = @transform_15, window_bounds = array<i64: 128, 32>}, {pipeline_mode = #tpu.pipeline_mode<synchronous>, transform_indices = @transform_16, window_bounds = array<i64: 1, 32>}, {transform_indices = @transform_17, window_bounds = array<i64: 1, 8, 32>}]} {
    %c0 = arith.constant 0 : index
    %c0_0 = arith.constant 0 : index
    %c0_1 = arith.constant 0 : index
    %0 = vector.load %arg1[%c0, %c0_0, %c0_1] : memref<1x8x32xf32, #tpu.memory_space<vmem>>, vector<1x8x32xf32>
    %1 = vector.shape_cast %0 : vector<1x8x32xf32> to vector<8x32xf32>
    %c0_2 = arith.constant 0 : index
    %c0_3 = arith.constant 0 : index
    %2 = vector.load %arg2[%c0_2, %c0_3] : memref<1x32xf32, #tpu.memory_space<vmem>>, vector<1x32xf32>
    %c0_4 = arith.constant 0 : index
    %c0_5 = arith.constant 0 : index
    %3 = vector.load %arg3[%c0_4, %c0_5] : memref<1x32xf32, #tpu.memory_space<vmem>>, vector<1x32xf32>
    %c0_6 = arith.constant 0 : index
    %c0_7 = arith.constant 0 : index
    %4 = vector.load %arg12[%c0_6, %c0_7] : memref<1x32xf32, #tpu.memory_space<vmem>>, vector<1x32xf32>
    %c0_8 = arith.constant 0 : index
    %c0_9 = arith.constant 0 : index
    %5 = vector.load %arg13[%c0_8, %c0_9] : memref<1x32xf32, #tpu.memory_space<vmem>>, vector<1x32xf32>
    %c0_10 = arith.constant 0 : index
    %c0_11 = arith.constant 0 : index
    %6 = vector.load %arg7[%c0_10, %c0_11] : memref<1x32xf32, #tpu.memory_space<vmem>>, vector<1x32xf32>
    %c0_12 = arith.constant 0 : index
    %c0_13 = arith.constant 0 : index
    %7 = vector.load %arg8[%c0_12, %c0_13] : memref<1x32xf32, #tpu.memory_space<vmem>>, vector<1x32xf32>
    %c0_14 = arith.constant 0 : index
    %c0_15 = arith.constant 0 : index
    %8 = vector.load %arg9[%c0_14, %c0_15] : memref<1x32xf32, #tpu.memory_space<vmem>>, vector<1x32xf32>
    %c0_16 = arith.constant 0 : index
    %c0_17 = arith.constant 0 : index
    %9 = vector.load %arg11[%c0_16, %c0_17] : memref<1x32xf32, #tpu.memory_space<vmem>>, vector<1x32xf32>
    %c0_18 = arith.constant 0 : index
    %c0_19 = arith.constant 0 : index
    %10 = vector.load %arg15[%c0_18, %c0_19] : memref<1x128xf32, #tpu.memory_space<vmem>>, vector<1x128xf32>
    %c0_20 = arith.constant 0 : index
    %c0_21 = arith.constant 0 : index
    %11 = vector.load %arg17[%c0_20, %c0_21] : memref<1x32xf32, #tpu.memory_space<vmem>>, vector<1x32xf32>
    %c0_22 = arith.constant 0 : index
    %c0_23 = arith.constant 0 : index
    %12 = vector.load %arg4[%c0_22, %c0_23] : memref<32x32xbf16, #tpu.memory_space<vmem>>, vector<32x32xbf16>
    %c0_24 = arith.constant 0 : index
    %c0_25 = arith.constant 0 : index
    %13 = vector.load %arg5[%c0_24, %c0_25] : memref<32x32xbf16, #tpu.memory_space<vmem>>, vector<32x32xbf16>
    %c0_26 = arith.constant 0 : index
    %c0_27 = arith.constant 0 : index
    %14 = vector.load %arg6[%c0_26, %c0_27] : memref<32x32xbf16, #tpu.memory_space<vmem>>, vector<32x32xbf16>
    %c0_28 = arith.constant 0 : index
    %c0_29 = arith.constant 0 : index
    %15 = vector.load %arg10[%c0_28, %c0_29] : memref<32x32xbf16, #tpu.memory_space<vmem>>, vector<32x32xbf16>
    %c0_30 = arith.constant 0 : index
    %c0_31 = arith.constant 0 : index
    %16 = vector.load %arg14[%c0_30, %c0_31] : memref<32x128xbf16, #tpu.memory_space<vmem>>, vector<32x128xbf16>
    %c0_32 = arith.constant 0 : index
    %c0_33 = arith.constant 0 : index
    %17 = vector.load %arg16[%c0_32, %c0_33] : memref<128x32xbf16, #tpu.memory_space<vmem>>, vector<128x32xbf16>
    %cst = arith.constant dense<0.000000e+00> : vector<8xf32>
    %18 = vector.multi_reduction <add>, %1, %cst [1] : vector<8x32xf32> to vector<8xf32>
    %19 = vector.shape_cast %18 : vector<8xf32> to vector<8x1xf32>
    %cst_34 = arith.constant 3.200000e+01 : f32
    %20 = vector.broadcast %cst_34 : f32 to vector<8x1xf32>
    %21 = arith.divf %19, %20 : vector<8x1xf32>
    %22 = vector.broadcast %21 : vector<8x1xf32> to vector<8x32xf32>
    %23 = arith.subf %1, %22 : vector<8x32xf32>
    %24 = arith.mulf %23, %23 : vector<8x32xf32>
    %cst_35 = arith.constant dense<0.000000e+00> : vector<8xf32>
    %25 = vector.multi_reduction <add>, %24, %cst_35 [1] : vector<8x32xf32> to vector<8xf32>
    %26 = vector.shape_cast %25 : vector<8xf32> to vector<8x1xf32>
    %cst_36 = arith.constant 3.200000e+01 : f32
    %27 = vector.broadcast %cst_36 : f32 to vector<8x1xf32>
    %28 = arith.divf %26, %27 : vector<8x1xf32>
    %29 = vector.broadcast %21 : vector<8x1xf32> to vector<8x32xf32>
    %30 = arith.subf %1, %29 : vector<8x32xf32>
    %cst_37 = arith.constant 9.99999974E-6 : f32
    %31 = vector.broadcast %cst_37 : f32 to vector<8x1xf32>
    %32 = arith.addf %28, %31 : vector<8x1xf32>
    %33 = math.rsqrt %32 : vector<8x1xf32>
    %34 = vector.broadcast %33 : vector<8x1xf32> to vector<8x32xf32>
    %35 = arith.mulf %30, %34 : vector<8x32xf32>
    %36 = vector.broadcast %2 : vector<1x32xf32> to vector<8x32xf32>
    %37 = arith.mulf %35, %36 : vector<8x32xf32>
    %38 = vector.broadcast %3 : vector<1x32xf32> to vector<8x32xf32>
    %39 = arith.addf %37, %38 : vector<8x32xf32>
    %40 = arith.truncf %39 : vector<8x32xf32> to vector<8x32xbf16>
    %cst_38 = arith.constant dense<0.000000e+00> : vector<8x32xf32>
    %41 = tpu.matmul %40, %12, %cst_38 {dimension_numbers = #tpu.dot_dimension_numbers<[1], [0], [0], [1], [0, 0, 1, 1], [], []>} : vector<8x32xbf16>, vector<32x32xbf16>, vector<8x32xf32> -> vector<8x32xf32>
    %42 = vector.broadcast %6 : vector<1x32xf32> to vector<8x32xf32>
    %43 = arith.addf %41, %42 : vector<8x32xf32>
    %cst_39 = arith.constant dense<0.000000e+00> : vector<8x32xf32>
    %44 = tpu.matmul %40, %13, %cst_39 {dimension_numbers = #tpu.dot_dimension_numbers<[1], [0], [0], [1], [0, 0, 1, 1], [], []>} : vector<8x32xbf16>, vector<32x32xbf16>, vector<8x32xf32> -> vector<8x32xf32>
    %45 = vector.broadcast %7 : vector<1x32xf32> to vector<8x32xf32>
    %46 = arith.addf %44, %45 : vector<8x32xf32>
    %cst_40 = arith.constant dense<0.000000e+00> : vector<8x32xf32>
    %47 = tpu.matmul %40, %14, %cst_40 {dimension_numbers = #tpu.dot_dimension_numbers<[1], [0], [0], [1], [0, 0, 1, 1], [], []>} : vector<8x32xbf16>, vector<32x32xbf16>, vector<8x32xf32> -> vector<8x32xf32>
    %48 = vector.broadcast %8 : vector<1x32xf32> to vector<8x32xf32>
    %49 = arith.addf %47, %48 : vector<8x32xf32>
    %cst_41 = arith.constant 0.353553385 : f32
    %50 = vector.broadcast %cst_41 : f32 to vector<8x32xf32>
    %51 = arith.mulf %43, %50 : vector<8x32xf32>
    %52 = arith.truncf %51 : vector<8x32xf32> to vector<8x32xbf16>
    %53 = arith.truncf %46 : vector<8x32xf32> to vector<8x32xbf16>
    %54 = arith.truncf %49 : vector<8x32xf32> to vector<8x32xbf16>
    %55 = vector.extract_strided_slice %52 {offsets = [0, 0], sizes = [8, 8], strides = [1, 1]} : vector<8x32xbf16> to vector<8x8xbf16>
    %56 = vector.extract_strided_slice %53 {offsets = [0, 0], sizes = [8, 8], strides = [1, 1]} : vector<8x32xbf16> to vector<8x8xbf16>
    %cst_42 = arith.constant dense<0.000000e+00> : vector<8x8xf32>
    %57 = tpu.matmul %55, %56, %cst_42 {dimension_numbers = #tpu.dot_dimension_numbers<[1], [1], [0], [0], [0, 0, 1, 0], [], []>} : vector<8x8xbf16>, vector<8x8xbf16>, vector<8x8xf32> -> vector<8x8xf32>
    %cst_43 = arith.constant dense<0xFF800000> : vector<8xf32>
    %58 = vector.multi_reduction <maximumf>, %57, %cst_43 [1] : vector<8x8xf32> to vector<8xf32>
    %59 = vector.shape_cast %58 : vector<8xf32> to vector<8x1xf32>
    %60 = vector.broadcast %59 : vector<8x1xf32> to vector<8x8xf32>
    %61 = arith.subf %57, %60 : vector<8x8xf32>
    %62 = math.exp %61 : vector<8x8xf32>
    %cst_44 = arith.constant dense<0.000000e+00> : vector<8xf32>
    %63 = vector.multi_reduction <add>, %62, %cst_44 [1] : vector<8x8xf32> to vector<8xf32>
    %64 = vector.shape_cast %63 : vector<8xf32> to vector<8x1xf32>
    %65 = arith.truncf %62 : vector<8x8xf32> to vector<8x8xbf16>
    %66 = vector.extract_strided_slice %54 {offsets = [0, 0], sizes = [8, 8], strides = [1, 1]} : vector<8x32xbf16> to vector<8x8xbf16>
    %cst_45 = arith.constant dense<0.000000e+00> : vector<8x8xf32>
    %67 = tpu.matmul %65, %66, %cst_45 {dimension_numbers = #tpu.dot_dimension_numbers<[1], [0], [0], [1], [0, 0, 1, 1], [], []>} : vector<8x8xbf16>, vector<8x8xbf16>, vector<8x8xf32> -> vector<8x8xf32>
    %68 = tpu.reciprocal %64 {approx = true} : vector<8x1xf32> -> vector<8x1xf32>
    %69 = vector.broadcast %68 : vector<8x1xf32> to vector<8x8xf32>
    %70 = arith.mulf %67, %69 : vector<8x8xf32>
    %c0_46 = arith.constant 0 : index
    %c0_47 = arith.constant 0 : index
    %71 = vector.load %arg19[%c0_46, %c0_47] : memref<8x32xf32, #tpu.memory_space<vmem>>, vector<8x8xf32>
    tpu.vector_store %arg19[%c0_46, %c0_47], %70 {strides = array<i32>} : memref<8x32xf32, #tpu.memory_space<vmem>>, vector<8x8xf32>,
    %72 = vector.extract_strided_slice %52 {offsets = [0, 8], sizes = [8, 8], strides = [1, 1]} : vector<8x32xbf16> to vector<8x8xbf16>
    %73 = vector.extract_strided_slice %53 {offsets = [0, 8], sizes = [8, 8], strides = [1, 1]} : vector<8x32xbf16> to vector<8x8xbf16>
    %cst_48 = arith.constant dense<0.000000e+00> : vector<8x8xf32>
    %74 = tpu.matmul %72, %73, %cst_48 {dimension_numbers = #tpu.dot_dimension_numbers<[1], [1], [0], [0], [0, 0, 1, 0], [], []>} : vector<8x8xbf16>, vector<8x8xbf16>, vector<8x8xf32> -> vector<8x8xf32>
    %cst_49 = arith.constant dense<0xFF800000> : vector<8xf32>
    %75 = vector.multi_reduction <maximumf>, %74, %cst_49 [1] : vector<8x8xf32> to vector<8xf32>
    %76 = vector.shape_cast %75 : vector<8xf32> to vector<8x1xf32>
    %77 = vector.broadcast %76 : vector<8x1xf32> to vector<8x8xf32>
    %78 = arith.subf %74, %77 : vector<8x8xf32>
    %79 = math.exp %78 : vector<8x8xf32>
    %cst_50 = arith.constant dense<0.000000e+00> : vector<8xf32>
    %80 = vector.multi_reduction <add>, %79, %cst_50 [1] : vector<8x8xf32> to vector<8xf32>
    %81 = vector.shape_cast %80 : vector<8xf32> to vector<8x1xf32>
    %82 = arith.truncf %79 : vector<8x8xf32> to vector<8x8xbf16>
    %83 = vector.extract_strided_slice %54 {offsets = [0, 8], sizes = [8, 8], strides = [1, 1]} : vector<8x32xbf16> to vector<8x8xbf16>
    %cst_51 = arith.constant dense<0.000000e+00> : vector<8x8xf32>
    %84 = tpu.matmul %82, %83, %cst_51 {dimension_numbers = #tpu.dot_dimension_numbers<[1], [0], [0], [1], [0, 0, 1, 1], [], []>} : vector<8x8xbf16>, vector<8x8xbf16>, vector<8x8xf32> -> vector<8x8xf32>
    %85 = tpu.reciprocal %81 {approx = true} : vector<8x1xf32> -> vector<8x1xf32>
    %86 = vector.broadcast %85 : vector<8x1xf32> to vector<8x8xf32>
    %87 = arith.mulf %84, %86 : vector<8x8xf32>
    %c0_52 = arith.constant 0 : index
    %c8 = arith.constant 8 : index
    %88 = vector.load %arg19[%c0_52, %c8] : memref<8x32xf32, #tpu.memory_space<vmem>>, vector<8x8xf32>
    tpu.vector_store %arg19[%c0_52, %c8], %87 {strides = array<i32>} : memref<8x32xf32, #tpu.memory_space<vmem>>, vector<8x8xf32>,
    %89 = vector.extract_strided_slice %52 {offsets = [0, 16], sizes = [8, 8], strides = [1, 1]} : vector<8x32xbf16> to vector<8x8xbf16>
    %90 = vector.extract_strided_slice %53 {offsets = [0, 16], sizes = [8, 8], strides = [1, 1]} : vector<8x32xbf16> to vector<8x8xbf16>
    %cst_53 = arith.constant dense<0.000000e+00> : vector<8x8xf32>
    %91 = tpu.matmul %89, %90, %cst_53 {dimension_numbers = #tpu.dot_dimension_numbers<[1], [1], [0], [0], [0, 0, 1, 0], [], []>} : vector<8x8xbf16>, vector<8x8xbf16>, vector<8x8xf32> -> vector<8x8xf32>
    %cst_54 = arith.constant dense<0xFF800000> : vector<8xf32>
    %92 = vector.multi_reduction <maximumf>, %91, %cst_54 [1] : vector<8x8xf32> to vector<8xf32>
    %93 = vector.shape_cast %92 : vector<8xf32> to vector<8x1xf32>
    %94 = vector.broadcast %93 : vector<8x1xf32> to vector<8x8xf32>
    %95 = arith.subf %91, %94 : vector<8x8xf32>
    %96 = math.exp %95 : vector<8x8xf32>
    %cst_55 = arith.constant dense<0.000000e+00> : vector<8xf32>
    %97 = vector.multi_reduction <add>, %96, %cst_55 [1] : vector<8x8xf32> to vector<8xf32>
    %98 = vector.shape_cast %97 : vector<8xf32> to vector<8x1xf32>
    %99 = arith.truncf %96 : vector<8x8xf32> to vector<8x8xbf16>
    %100 = vector.extract_strided_slice %54 {offsets = [0, 16], sizes = [8, 8], strides = [1, 1]} : vector<8x32xbf16> to vector<8x8xbf16>
    %cst_56 = arith.constant dense<0.000000e+00> : vector<8x8xf32>
    %101 = tpu.matmul %99, %100, %cst_56 {dimension_numbers = #tpu.dot_dimension_numbers<[1], [0], [0], [1], [0, 0, 1, 1], [], []>} : vector<8x8xbf16>, vector<8x8xbf16>, vector<8x8xf32> -> vector<8x8xf32>
    %102 = tpu.reciprocal %98 {approx = true} : vector<8x1xf32> -> vector<8x1xf32>
    %103 = vector.broadcast %102 : vector<8x1xf32> to vector<8x8xf32>
    %104 = arith.mulf %101, %103 : vector<8x8xf32>
    %c0_57 = arith.constant 0 : index
    %c16 = arith.constant 16 : index
    %105 = vector.load %arg19[%c0_57, %c16] : memref<8x32xf32, #tpu.memory_space<vmem>>, vector<8x8xf32>
    tpu.vector_store %arg19[%c0_57, %c16], %104 {strides = array<i32>} : memref<8x32xf32, #tpu.memory_space<vmem>>, vector<8x8xf32>,
    %106 = vector.extract_strided_slice %52 {offsets = [0, 24], sizes = [8, 8], strides = [1, 1]} : vector<8x32xbf16> to vector<8x8xbf16>
    %107 = vector.extract_strided_slice %53 {offsets = [0, 24], sizes = [8, 8], strides = [1, 1]} : vector<8x32xbf16> to vector<8x8xbf16>
    %cst_58 = arith.constant dense<0.000000e+00> : vector<8x8xf32>
    %108 = tpu.matmul %106, %107, %cst_58 {dimension_numbers = #tpu.dot_dimension_numbers<[1], [1], [0], [0], [0, 0, 1, 0], [], []>} : vector<8x8xbf16>, vector<8x8xbf16>, vector<8x8xf32> -> vector<8x8xf32>
    %cst_59 = arith.constant dense<0xFF800000> : vector<8xf32>
    %109 = vector.multi_reduction <maximumf>, %108, %cst_59 [1] : vector<8x8xf32> to vector<8xf32>
    %110 = vector.shape_cast %109 : vector<8xf32> to vector<8x1xf32>
    %111 = vector.broadcast %110 : vector<8x1xf32> to vector<8x8xf32>
    %112 = arith.subf %108, %111 : vector<8x8xf32>
    %113 = math.exp %112 : vector<8x8xf32>
    %cst_60 = arith.constant dense<0.000000e+00> : vector<8xf32>
    %114 = vector.multi_reduction <add>, %113, %cst_60 [1] : vector<8x8xf32> to vector<8xf32>
    %115 = vector.shape_cast %114 : vector<8xf32> to vector<8x1xf32>
    %116 = arith.truncf %113 : vector<8x8xf32> to vector<8x8xbf16>
    %117 = vector.extract_strided_slice %54 {offsets = [0, 24], sizes = [8, 8], strides = [1, 1]} : vector<8x32xbf16> to vector<8x8xbf16>
    %cst_61 = arith.constant dense<0.000000e+00> : vector<8x8xf32>
    %118 = tpu.matmul %116, %117, %cst_61 {dimension_numbers = #tpu.dot_dimension_numbers<[1], [0], [0], [1], [0, 0, 1, 1], [], []>} : vector<8x8xbf16>, vector<8x8xbf16>, vector<8x8xf32> -> vector<8x8xf32>
    %119 = tpu.reciprocal %115 {approx = true} : vector<8x1xf32> -> vector<8x1xf32>
    %120 = vector.broadcast %119 : vector<8x1xf32> to vector<8x8xf32>
    %121 = arith.mulf %118, %120 : vector<8x8xf32>
    %c0_62 = arith.constant 0 : index
    %c24 = arith.constant 24 : index
    %122 = vector.load %arg19[%c0_62, %c24] : memref<8x32xf32, #tpu.memory_space<vmem>>, vector<8x8xf32>
    tpu.vector_store %arg19[%c0_62, %c24], %121 {strides = array<i32>} : memref<8x32xf32, #tpu.memory_space<vmem>>, vector<8x8xf32>,
    %c0_63 = arith.constant 0 : index
    %c0_64 = arith.constant 0 : index
    %123 = vector.load %arg19[%c0_63, %c0_64] : memref<8x32xf32, #tpu.memory_space<vmem>>, vector<8x32xf32>
    %124 = arith.truncf %123 : vector<8x32xf32> to vector<8x32xbf16>
    %cst_65 = arith.constant dense<0.000000e+00> : vector<8x32xf32>
    %125 = tpu.matmul %124, %15, %cst_65 {dimension_numbers = #tpu.dot_dimension_numbers<[1], [0], [0], [1], [0, 0, 1, 1], [], []>} : vector<8x32xbf16>, vector<32x32xbf16>, vector<8x32xf32> -> vector<8x32xf32>
    %126 = vector.broadcast %9 : vector<1x32xf32> to vector<8x32xf32>
    %127 = arith.addf %125, %126 : vector<8x32xf32>
    %128 = arith.addf %1, %127 : vector<8x32xf32>
    %cst_66 = arith.constant dense<0.000000e+00> : vector<8xf32>
    %129 = vector.multi_reduction <add>, %128, %cst_66 [1] : vector<8x32xf32> to vector<8xf32>
    %130 = vector.shape_cast %129 : vector<8xf32> to vector<8x1xf32>
    %cst_67 = arith.constant 3.200000e+01 : f32
    %131 = vector.broadcast %cst_67 : f32 to vector<8x1xf32>
    %132 = arith.divf %130, %131 : vector<8x1xf32>
    %133 = vector.broadcast %132 : vector<8x1xf32> to vector<8x32xf32>
    %134 = arith.subf %128, %133 : vector<8x32xf32>
    %135 = arith.mulf %134, %134 : vector<8x32xf32>
    %cst_68 = arith.constant dense<0.000000e+00> : vector<8xf32>
    %136 = vector.multi_reduction <add>, %135, %cst_68 [1] : vector<8x32xf32> to vector<8xf32>
    %137 = vector.shape_cast %136 : vector<8xf32> to vector<8x1xf32>
    %cst_69 = arith.constant 3.200000e+01 : f32
    %138 = vector.broadcast %cst_69 : f32 to vector<8x1xf32>
    %139 = arith.divf %137, %138 : vector<8x1xf32>
    %140 = vector.broadcast %132 : vector<8x1xf32> to vector<8x32xf32>
    %141 = arith.subf %128, %140 : vector<8x32xf32>
    %cst_70 = arith.constant 9.99999974E-6 : f32
    %142 = vector.broadcast %cst_70 : f32 to vector<8x1xf32>
    %143 = arith.addf %139, %142 : vector<8x1xf32>
    %144 = math.rsqrt %143 : vector<8x1xf32>
    %145 = vector.broadcast %144 : vector<8x1xf32> to vector<8x32xf32>
    %146 = arith.mulf %141, %145 : vector<8x32xf32>
    %147 = vector.broadcast %4 : vector<1x32xf32> to vector<8x32xf32>
    %148 = arith.mulf %146, %147 : vector<8x32xf32>
    %149 = vector.broadcast %5 : vector<1x32xf32> to vector<8x32xf32>
    %150 = arith.addf %148, %149 : vector<8x32xf32>
    %151 = arith.truncf %150 : vector<8x32xf32> to vector<8x32xbf16>
    %cst_71 = arith.constant dense<0.000000e+00> : vector<8x128xf32>
    %152 = tpu.matmul %151, %16, %cst_71 {dimension_numbers = #tpu.dot_dimension_numbers<[1], [0], [0], [1], [0, 0, 1, 1], [], []>} : vector<8x32xbf16>, vector<32x128xbf16>, vector<8x128xf32> -> vector<8x128xf32>
    %153 = vector.broadcast %10 : vector<1x128xf32> to vector<8x128xf32>
    %154 = arith.addf %152, %153 : vector<8x128xf32>
    %cst_72 = arith.constant 5.000000e-01 : f32
    %155 = vector.broadcast %cst_72 : f32 to vector<8x128xf32>
    %156 = arith.mulf %155, %154 : vector<8x128xf32>
    %cst_73 = arith.constant 0.707106769 : f32
    %157 = vector.broadcast %cst_73 : f32 to vector<8x128xf32>
    %158 = arith.mulf %154, %157 : vector<8x128xf32>
    %159 = math.erf %158 : vector<8x128xf32>
    %cst_74 = arith.constant 1.000000e+00 : f32
    %160 = vector.broadcast %cst_74 : f32 to vector<8x128xf32>
    %161 = arith.addf %160, %159 : vector<8x128xf32>
    %162 = arith.mulf %156, %161 : vector<8x128xf32>
    %163 = arith.truncf %162 : vector<8x128xf32> to vector<8x128xbf16>
    %cst_75 = arith.constant dense<0.000000e+00> : vector<8x32xf32>
    %164 = tpu.matmul %163, %17, %cst_75 {dimension_numbers = #tpu.dot_dimension_numbers<[1], [0], [0], [1], [0, 0, 1, 1], [], []>} : vector<8x128xbf16>, vector<128x32xbf16>, vector<8x32xf32> -> vector<8x32xf32>
    %165 = vector.broadcast %11 : vector<1x32xf32> to vector<8x32xf32>
    %166 = arith.addf %164, %165 : vector<8x32xf32>
    %167 = arith.addf %128, %166 : vector<8x32xf32>
    %c0_76 = arith.constant 0 : index
    %c0_77 = arith.constant 0 : index
    %c0_78 = arith.constant 0 : index
    %168 = vector.load %arg18[%c0_76, %c0_77, %c0_78] : memref<1x8x32xf32, #tpu.memory_space<vmem>>, vector<1x8x32xf32>
    %169 = vector.shape_cast %168 : vector<1x8x32xf32> to vector<8x32xf32>
    %170 = vector.shape_cast %167 : vector<8x32xf32> to vector<1x8x32xf32>
    tpu.vector_store %arg18[%c0_76, %c0_77, %c0_78], %170 {strides = array<i32>} : memref<1x8x32xf32, #tpu.memory_space<vmem>>, vector<1x8x32xf32>,
    return
  }
  func.func @transform_0(%arg0: i32) -> (i32, i32, i32) {
    %c0_i32 = arith.constant 0 : i32
    %c0_i32_0 = arith.constant 0 : i32
    %c0_i32_1 = arith.constant 0 : i32
    return %arg0, %c0_i32, %c0_i32_0 : i32, i32, i32
  }
  func.func @transform_1(%arg0: i32) -> (i32, i32) {
    %c0_i32 = arith.constant 0 : i32
    %c0_i32_0 = arith.constant 0 : i32
    %c0_i32_1 = arith.constant 0 : i32
    return %c0_i32, %c0_i32_0 : i32, i32
  }
  func.func @transform_2(%arg0: i32) -> (i32, i32) {
    %c0_i32 = arith.constant 0 : i32
    %c0_i32_0 = arith.constant 0 : i32
    %c0_i32_1 = arith.constant 0 : i32
    return %c0_i32, %c0_i32_0 : i32, i32
  }
  func.func @transform_3(%arg0: i32) -> (i32, i32) {
    %c0_i32 = arith.constant 0 : i32
    %c0_i32_0 = arith.constant 0 : i32
    %c0_i32_1 = arith.constant 0 : i32
    return %c0_i32, %c0_i32_0 : i32, i32
  }
  func.func @transform_4(%arg0: i32) -> (i32, i32) {
    %c0_i32 = arith.constant 0 : i32
    %c0_i32_0 = arith.constant 0 : i32
    %c0_i32_1 = arith.constant 0 : i32
    return %c0_i32, %c0_i32_0 : i32, i32
  }
  func.func @transform_5(%arg0: i32) -> (i32, i32) {
    %c0_i32 = arith.constant 0 : i32
    %c0_i32_0 = arith.constant 0 : i32
    %c0_i32_1 = arith.constant 0 : i32
    return %c0_i32, %c0_i32_0 : i32, i32
  }
  func.func @transform_6(%arg0: i32) -> (i32, i32) {
    %c0_i32 = arith.constant 0 : i32
    %c0_i32_0 = arith.constant 0 : i32
    %c0_i32_1 = arith.constant 0 : i32
    return %c0_i32, %c0_i32_0 : i32, i32
  }
  func.func @transform_7(%arg0: i32) -> (i32, i32) {
    %c0_i32 = arith.constant 0 : i32
    %c0_i32_0 = arith.constant 0 : i32
    %c0_i32_1 = arith.constant 0 : i32
    return %c0_i32, %c0_i32_0 : i32, i32
  }
  func.func @transform_8(%arg0: i32) -> (i32, i32) {
    %c0_i32 = arith.constant 0 : i32
    %c0_i32_0 = arith.constant 0 : i32
    %c0_i32_1 = arith.constant 0 : i32
    return %c0_i32, %c0_i32_0 : i32, i32
  }
  func.func @transform_9(%arg0: i32) -> (i32, i32) {
    %c0_i32 = arith.constant 0 : i32
    %c0_i32_0 = arith.constant 0 : i32
    %c0_i32_1 = arith.constant 0 : i32
    return %c0_i32, %c0_i32_0 : i32, i32
  }
  func.func @transform_10(%arg0: i32) -> (i32, i32) {
    %c0_i32 = arith.constant 0 : i32
    %c0_i32_0 = arith.constant 0 : i32
    %c0_i32_1 = arith.constant 0 : i32
    return %c0_i32, %c0_i32_0 : i32, i32
  }
  func.func @transform_11(%arg0: i32) -> (i32, i32) {
    %c0_i32 = arith.constant 0 : i32
    %c0_i32_0 = arith.constant 0 : i32
    %c0_i32_1 = arith.constant 0 : i32
    return %c0_i32, %c0_i32_0 : i32, i32
  }
  func.func @transform_12(%arg0: i32) -> (i32, i32) {
    %c0_i32 = arith.constant 0 : i32
    %c0_i32_0 = arith.constant 0 : i32
    %c0_i32_1 = arith.constant 0 : i32
    return %c0_i32, %c0_i32_0 : i32, i32
  }
  func.func @transform_13(%arg0: i32) -> (i32, i32) {
    %c0_i32 = arith.constant 0 : i32
    %c0_i32_0 = arith.constant 0 : i32
    %c0_i32_1 = arith.constant 0 : i32
    return %c0_i32, %c0_i32_0 : i32, i32
  }
  func.func @transform_14(%arg0: i32) -> (i32, i32) {
    %c0_i32 = arith.constant 0 : i32
    %c0_i32_0 = arith.constant 0 : i32
    %c0_i32_1 = arith.constant 0 : i32
    return %c0_i32, %c0_i32_0 : i32, i32
  }
  func.func @transform_15(%arg0: i32) -> (i32, i32) {
    %c0_i32 = arith.constant 0 : i32
    %c0_i32_0 = arith.constant 0 : i32
    %c0_i32_1 = arith.constant 0 : i32
    return %c0_i32, %c0_i32_0 : i32, i32
  }
  func.func @transform_16(%arg0: i32) -> (i32, i32) {
    %c0_i32 = arith.constant 0 : i32
    %c0_i32_0 = arith.constant 0 : i32
    %c0_i32_1 = arith.constant 0 : i32
    return %c0_i32, %c0_i32_0 : i32, i32
  }
  func.func @transform_17(%arg0: i32) -> (i32, i32, i32) {
    %c0_i32 = arith.constant 0 : i32
    %c0_i32_0 = arith.constant 0 : i32
    %c0_i32_1 = arith.constant 0 : i32
    return %arg0, %c0_i32, %c0_i32_0 : i32, i32, i32
  }
}

</mosaic_0001>

<bundles_post_ra>
// kernel: tpu_custom_call.1
= control target key start
LH: loop header
LB: loop body
LE: loop exit
PB: predicated region body
PF: predicated region fallthrough
CT: control target
= control target key end

     0   :  { %s2002_s0 = inlined_call_operand.vmem [shape: f32[2,8,32], index: 0, kind: input, shape index: {}]   ;;  %s2003_s1 = inlined_call_operand.hbm [shape: f32[1,32], index: 1, kind: input, shape index: {}]   ;;  %s2004_s2 = inlined_call_operand.vmem [shape: f32[1,32], index: 2, kind: input, shape index: {}]   ;;  %s2005_s3 = inlined_call_operand.vmem [shape: bf16[32,32], index: 3, kind: input, shape index: {}]   ;;  %s2006_s4 = inlined_call_operand.vmem [shape: bf16[32,32], index: 4, kind: input, shape index: {}]   ;;  %s2007_s5 = inlined_call_operand.vmem [shape: bf16[32,32], index: 5, kind: input, shape index: {}]   ;;  %s2008_s6 = inlined_call_operand.vmem [shape: f32[1,32], index: 6, kind: input, shape index: {}]   ;;  %s2009_s7 = inlined_call_operand.vmem [shape: f32[1,32], index: 7, kind: input, shape index: {}]   ;;  %s2010_s8 = inlined_call_operand.vmem [shape: f32[1,32], index: 8, kind: input, shape index: {}]   ;;  %s2011_s9 = inlined_call_operand.vmem [shape: bf16[32,32], index: 9, kind: input, shape index: {}]   ;;  %s2012_s10 = inlined_call_operand.vmem [shape: f32[1,32], index: 10, kind: input, shape index: {}]   ;;  %s2013_s11 = inlined_call_operand.vmem [shape: f32[1,32], index: 11, kind: input, shape index: {}]   ;;  %s2014_s12 = inlined_call_operand.vmem [shape: f32[1,32], index: 12, kind: input, shape index: {}]   ;;  %s2015_s13 = inlined_call_operand.hbm [shape: bf16[32,128], index: 13, kind: input, shape index: {}]   ;;  %s2016_s14 = inlined_call_operand.vmem [shape: f32[1,128], index: 14, kind: input, shape index: {}]   ;;  %s2017_s15 = inlined_call_operand.vmem [shape: bf16[128,32], index: 15, kind: input, shape index: {}]   ;;  %s2018_s16 = inlined_call_operand.vmem [shape: f32[1,32], index: 16, kind: input, shape index: {}]   ;;  %s2019_s17 = inlined_call_operand.hbm [shape: f32[2,8,32], index: 17, kind: output, shape index: {}]  }
   0x1   :  { %2026 = sst [smem:[#allocation18_spill]] %s2002_s0 }
   0x2   :  { %2027 = sst [smem:[#allocation19_spill]] %s2003_s1 }
   0x3   :  { %2028 = sst [smem:[#allocation20_spill]] %s2004_s2 }
   0x4   :  { %22 = vsyncpa [#allocation4], 0 }
   0x5   :  { %23 = vsyncpa [#allocation7], 0 }
   0x6   :  { %24 = vsyncpa [#allocation5], 0 }
   0x7   :  { %26 = vsyncpa [#allocation5 + $0x1], 0  ;;  %s1760_s24 = smov 0   ;;  %s1762_s25 = smov 0  }
   0x8   :  { %s1764_s26 = smov 0   ;;  %s1766_s27 = smov 0  }
   0x9 LB: > { %2029 = sst [smem:[#allocation12_spill]] %s1645_s24  ;;  %s1781_s28 = sadd.s32 4294967295, %s1657_s27   ;;  %s1657_s27 = sphi %s1766_s27, %s2044_s27   ;;  %s1653_s26 = sphi %s1764_s26, %s2046_s26   ;;  %s1649_s25 = sphi %s1762_s25, %s2048_s25   ;;  %s1645_s24 = sphi %s1760_s24, %s2047_s24  }
   0xa   : > { %2030 = sst [smem:[#allocation13_spill]] %s1653_s26  ;;  %s1306_s29 = sadd.s32 4294967294, %s1657_s27  }
   0xb   : > { %2031 = sst [smem:[#allocation14_spill]] %s1657_s27  ;;  %s1785_s0 = sadd.s32 1, %s1657_s27  }
   0xc   : > { %2032 = sst [smem:[#allocation15_spill]] %s1785_s0  ;;  %s401_s30 = sadd.s32 1, %s1653_s26 }
   0xd   : > { %s398_s18 = ssub.s32 %s1657_s27, %s1785_s0  ;;  %p411_p0 = scmp.ne.s32.totalorder %s1653_s26, %s1649_s25 }
   0xe   : > { %p399_p1 = scmp.eq.s32.totalorder %s398_s18, 0  ;;  %p412_p2 = scmp.eq.s32.totalorder %s1781_s28, 1 }
   0xf   : > { %p417_p3 = scmp.ne.s32.totalorder %s1649_s25, %s1645_s24  ;;  %p418_p4 = scmp.eq.s32.totalorder %s1306_s29, 1 }
  0x10   : > { %s1796_s19 = scalar_select %p399_p1, %s1653_s26, %s401_s30  }
  0x11   : > { %p1798_p5 = por %p412_p2, %p411_p0  ;;  %p1802_p6 = por %p418_p4, %p417_p3 }
  0x12   : > { %2033 = sst [smem:[#allocation16_spill]] %s1796_s19  ;;  %p1307_p7 = scmp.ge.s32.totalorder %s1657_s27, 1 }
  0x13   : > { %s2035_s20 = scalar_select %p1802_p6, 1, 0 }
  0x14   : > { %p425_p8 = scmp.lt.s32.totalorder %s1657_s27, 3  ;;  %p1445_p9 = scmp.eq.s32.totalorder %s1781_s28, 0 }
  0x15   : > { %2036 = sst [smem:[#allocation17_spill]] %s2035_s20  ;;  %s1659_s18 = smov [#allocation3]  }
  0x16   : > { %p1809_p10 = pnand %p1307_p7, %p425_p8  ;;  %s2038_s29 = sld [smem:[#allocation19_spill]] }
  0x17   : > { %s439_s19 = sshll.u32 %s1659_s18, 4  ;;  %s481_s20 = sshll.u32 %s2015_s13, 4  ;;  %s440_s19 = int_to_ptr.vmem [resolvable:$true] %s439_s19  ;;  %s482_s20 = int_to_ptr.hbm [resolvable:$true] %s481_s20 }
  0x18   : > { %p1434_p11 = pneg %p1809_p10  ;;  %s1660_s24 = smov [#allocation6]  }
  0x19   : > { %s483_s27 = sshll.u32 %s1660_s24, 4  ;;  %s1661_s22 = smov 64   ;;  %s484_s27 = int_to_ptr.vmem [resolvable:$true] %s483_s27 }
  0x1a   : > { %p1435_p12 = pnand %p1445_p9, %p1434_p11  ;;  %s1662_s23 = smov 4  }
  0x1b   : > { %515 = sbr.rel (%p1809_p10) target bundleno = 1828 (0x724), region = 88 }
  0x1c   : > { %s437_s30 = sshll.u32 %s2038_s29, 4  ;;  %s438_s30 = int_to_ptr.hbm [resolvable:$true] %s437_s30 }
  0x1d   : > { %1437 = dma.hbm_to_vmem [thread:$0]  (!%p1435_p12), %s438_s30, 16, %s440_s19, [#allocation4]  }
  0x1e   : > { %1440 = dma.hbm_to_vmem [thread:$0]  (!%p1435_p12), %s482_s20, 256, %s484_s27, [#allocation7], %s1661_s22, %s1661_s22, %s1662_s23  }
  0x20   : > { %1632 = dma.done.wait (%p1445_p9), [#allocation4], 16  }
  0x21   : > { %1634 = vsyncadd (%p1445_p9), [#allocation4], 4294967280 }
  0x22   : > { %1636 = dma.done.wait (%p1445_p9), [#allocation7], 256  }
  0x23   : > { %1638 = vsyncadd (%p1445_p9), [#allocation7], 4294967040  ;;  %p572_p13 = scmp.lt.s32.totalorder %s1781_s28, 1  ;;  %s2039_s19 = sld [smem:[#allocation18_spill]]  ;;  %vm624_vm0 = vcmask 261120   ;;  %v1663_v2 = vmov 32.0  }
  0x24   : > { %1503 = vrcp.f32 %v1663_v2  ;;  %v1407_v14 = vld [vmem:[%s2005_s3 + $0x8] sm:$0xff]  ;;  %v1406_v16 = vld [vmem:[%s2005_s3] sm:$0xff]  ;;  %s2040_s2 = sld [smem:[#allocation20_spill]]  ;;  %vm754_vm5 = vcmask 64512   ;;  %vm787_vm6 = vcmask 1043456   ;;  %s1668_s21 = smov 16  }
  0x25   : > { %s573_s24 = scalar_select %p572_p13, %s1781_s28, 1  ;;  %v1409_v15 = vld [vmem:[%s2006_s4 + $0x8] sm:$0xff]  ;;  %687 = vmatpush.bf16.msra.mxu0 %v1407_v14  ;;  %v1408_v17 = vld [vmem:[%s2006_s4] sm:$0xff]  ;;  %vm876_vm7 = vcmask 130112   ;;  %vm938_vm8 = vcmask 195712   ;;  %vm1000_vm9 = vcmask 261312  }
  0x26   : > { %715 = vmatpush.bf16.msra.mxu2 %v1409_v15  ;;  %v1411_v18 = vld [vmem:[%s2007_s5 + $0x8] sm:$0xff]  ;;  %v1410_v21 = vld [vmem:[%s2007_s5] sm:$0xff]  ;;  %s1669_s29 = smov 24   ;;  %s1403_s27 = sshll.u32 %s1781_s28, 3 }
  0x27   : > { %s1315_s26 = sshll.u32 %s573_s24, 3  ;;  %v1493_v29 = vld [vmem:[#allocation3] ss:$0 sm:$0xff]  ;;  %v1495_v36 = vld [vmem:[%s2008_s6] ss:$0 sm:$0xff]  ;;  %s1664_s24 = smov 112  }
  0x28   : > { %v1496_v40 = vld [vmem:[%s2009_s7] ss:$0 sm:$0xff] }
  0x29   : > { %s575_s20 = scalar_lea.vmem %s2039_s19, %s1315_s26  ;;  %688 = vmatpush.bf16.msra.mxu0 %v1406_v16  ;;  %s1665_s26 = smov 120   ;;  %v1497_v52 = vld [vmem:[%s2010_s8] ss:$0 sm:$0xff] }
  0x2a   : > { %v1838_v0 = vld [vmem:[%s575_s20] sm:$0xff]  ;;  %v1504_v3 = vpop.eup %1503  ;;  %716 = vmatpush.bf16.msra.mxu2 %v1408_v17  ;;  %s1666_s19 = smov 104   ;;  %s1667_s20 = smov 8  }
  0x2b   : > { %v625_v1 = vsel %vm624_vm0, %v1838_v0, 0.0  ;;  %v629_v4 = vmul.f32 32.0, %v1504_v3  ;;  %vm633_vm1 = vweird.f32 %v1504_v3  ;;  %v1494_v32 = vld [vmem:[%s2040_s2] ss:$0 sm:$0xff] }
  0x2c   : > { %626 = vadd.xlane.f32.xlu0 %v625_v1 }
  0x2d   : > { %v630_v5 = vsub.f32 1.0, %v629_v4 }
  0x2e   : > { %743 = vmatpush.bf16.msrb.mxu2 %v1411_v18 }
  0x2f   : > { %v631_v6 = vmul.f32 %v1504_v3, %v630_v5 }
  0x31   : > { %v632_v7 = vadd.f32 %v1504_v3, %v631_v6 }
  0x32   : > { %744 = vmatpush.bf16.msrb.mxu2 %v1410_v21 }
  0x33   : > { %v1842_v8 = vsel %vm633_vm1, %v1504_v3, %v632_v7 }
  0x9f   : > { %v627_v9 = vpop.xlane.xlu0 %626 }
  0xa0   : > { %v635_v10 = vmul.f32 %v1842_v8, %v627_v9 }
  0xa2   : > { %v636_v11 = vsub.f32 %v1838_v0, %v635_v10 }
  0xa4   : > { %v637_v12 = vmul.f32 %v636_v11, %v636_v11 }
  0xa6   : > { %v638_v13 = vsel %vm624_vm0, %v637_v12, 0.0 }
  0xa7   : > { %639 = vadd.xlane.f32.xlu0 %v638_v13 }
 0x11a   : > { %v640_v19 = vpop.xlane.xlu0 %639 }
 0x11b   : > { %v641_v20 = vmul.f32 %v640_v19, %v1842_v8 }
 0x11d   : > { %v642_v22 = vadd.f32 1e-05, %v641_v20 }
 0x11f   : > { %1505 = vrsqrt.f32 %v642_v22  ;;  %vm649_vm3 = vweird.f32 %v642_v22 }
 0x125   : > { %v1506_v23 = vpop.eup %1505 }
 0x126   : > { %v644_v24 = vmul.f32 %v1506_v23, %v642_v22  ;;  %vm650_vm2 = vweird.f32 %v1506_v23 }
 0x127   : > { %vm651_vm4 = vmor %vm649_vm3, %vm650_vm2 }
 0x128   : > { %v645_v25 = vmul.f32 %v1506_v23, %v644_v24 }
 0x12a   : > { %v646_v26 = vmul.f32 0.5, %v645_v25 }
 0x12c   : > { %v647_v27 = vsub.f32 1.5, %v646_v26 }
 0x12e   : > { %v648_v28 = vmul.f32 %v1506_v23, %v647_v27 }
 0x130   : > { %v652_v30 = vsel %vm651_vm4, %v1506_v23, %v648_v28 }
 0x131   : > { %v653_v31 = vmul.f32 %v652_v30, %v636_v11 }
 0x133   : > { %v657_v33 = vmul.f32 %v1493_v29, %v653_v31 }
 0x135   : > { %v661_v34 = vadd.f32 %v1494_v32, %v657_v33 }
 0x137   : > { %v662_v35 = vpack.c.bf16 %v661_v34, %v661_v34 }
 0x139   : > { %1324 = vmatmul.msk.bf16.vlgmr.msra.gmra.mxu0 %vm624_vm0, %v662_v35  ;;  %1333 = vmatmul.msk.bf16.vlgmr.msra.gmra.mxu2 %vm624_vm0, %v662_v35 }
 0x149   : > { %1342 = vmatmul.msk.bf16.vlgmr.msrb.gmra.mxu2 %vm624_vm0, %v662_v35 }
 0x1b6   : > { %v690_v37 = vpop.f32.mrf.mxu0 }
 0x1b7   : > { %v691_v38 = vadd.f32 %v1495_v36, %v690_v37 }
 0x1b9   : > { %v750_v39 = vmul.f32 0.35355338, %v691_v38 }
 0x1bb   : > { %v751_v41 = vpack.c.bf16 %v750_v39, %v750_v39 }
 0x1bc   : > { %v718_v42 = vpop.f32.mrf.mxu2 }
 0x1bd   : > { %v808_v43 = vunpack.c.l.b16 %v751_v41  ;;  %v719_v44 = vadd.f32 %v1496_v40, %v718_v42 }
 0x1be   : > { %v692_v45 = vpop.f32.mrf.mxu0 }
 0x1bf   : > { %v752_v46 = vpack.c.bf16 %v719_v44, %v719_v44  ;;  %v809_v47 = vpack.c.b16 %v808_v43, %v808_v43 }
 0x1c1   : > { %v813_v48 = vunpack.c.l.b16 %v752_v46  ;;  %878 = vrot.lane.b32.xlu0 %v809_v47, %s1664_s24  ;;  %v759_v49 = vsel %vm754_vm5, %v752_v46, 0 }
 0x1c2   : > { %768 = vmatpush.bf16.xpose.msra.mxu3 %v759_v49 }
 0x1c3   : > { %v814_v50 = vpack.c.b16 %v813_v48, %v813_v48 }
 0x1c4   : > { %v720_v51 = vpop.f32.mrf.mxu2 }
 0x1c5   : > { %880 = vrot.lane.b32.xlu2 %v814_v50, %s1664_s24  ;;  %815 = vrot.lane.b32.xlu1 %v814_v50, %s1665_s26 }
 0x1c9   : > { %1343 = vmatmul.msk.bf16.vlgmr.msra.gmra.mxu3 %vm754_vm5, %v751_v41 }
 0x1cc   : > { %v746_v53 = vpop.f32.mrf.mxu2 }
 0x1cd   : > { %v747_v54 = vadd.f32 %v1497_v52, %v746_v53  ;;  %942 = vrot.lane.b32.xlu2 %v814_v50, %s1666_s19  ;;  %810 = vrot.lane.b32.xlu1 %v809_v47, %s1665_s26 }
 0x1cf   : > { %v753_v55 = vpack.c.bf16 %v747_v54, %v747_v54 }
 0x1d1   : > { %v847_v56 = vunpack.c.l.b16 %v753_v55  ;;  %v789_v57 = vsel %vm787_vm6, %v753_v55, 0 }
 0x1d2   : > { %798 = vmatpush.bf16.msrb.mxu0 %v789_v57 }
 0x1d3   : > { %v848_v58 = vpack.c.b16 %v847_v56, %v847_v56 }
 0x1d4   : > { %v748_v59 = vpop.f32.mrf.mxu2 }
 0x1d5   : > { %849 = vrot.lane.b32.xlu0 %v848_v58, %s1665_s26  ;;  %940 = vrot.lane.b32.xlu1 %v809_v47, %s1666_s19 }
 0x21f   : > { %v881_v60 = vpop.permute.xlu2 %880 }
 0x220   : > { %v886_v61 = vsel %vm754_vm5, %v881_v60, 0 }
 0x221   : > { %895 = vmatpush.bf16.xpose.msrb.mxu3 %v886_v61 }
 0x227   : > { %v943_v63 = vpop.permute.xlu2 %942 }
 0x228   : > { %v948_v3 = vsel %vm754_vm5, %v943_v63, 0 }
 0x233   : > { %v879_v62 = vpop.permute.xlu0 %878 }
 0x234   : > { %1347 = vmatmul.msk.bf16.vlgmr.msrb.gmra.mxu3 %vm754_vm5, %v879_v62 }
 0x237   : > { %v816_v1 = vpop.permute.xlu1 %815 }
 0x238   : > { %v821_v2 = vsel %vm754_vm5, %v816_v1, 0 }
 0x239   : > { %830 = vmatpush.bf16.xpose.msra.mxu1 %v821_v2 }
 0x23f   : > { %v811_v4 = vpop.permute.xlu1 %810 }
 0x240   : > { %1345 = vmatmul.msk.bf16.vlgmr.msra.gmra.mxu1 %vm754_vm5, %v811_v4 }
 0x241   : > { %957 = vmatpush.bf16.xpose.msrb.mxu1 %v948_v3 }
 0x247   : > { %v850_v5 = vpop.permute.xlu0 %849  ;;  %v941_v10 = vpop.permute.xlu1 %940 }
 0x248   : > { %v855_v6 = vsel %vm787_vm6, %v850_v5, 0 }
 0x249   : > { %864 = vmatpush.bf16.msra.mxu2 %v855_v6  ;;  %v1413_v6 = vld [vmem:[%s2011_s9 + $0x8] sm:$0xff] }
 0x24a   : > { %1028 = vmatpush.bf16.msra.mxu3 %v1413_v6 }
 0x24c   : > { %v770_v7 = vpop.f32.mrf.mxu3 }
 0x24d   : > { %v774_v9 = vsel %vm754_vm5, %v770_v7, -inf }
 0x24e   : > { %775 = vmax.xlane.f32.xlu1 %v774_v9 }
 0x250   : > { %1349 = vmatmul.msk.bf16.vlgmr.msrb.gmra.mxu1 %vm754_vm5, %v941_v10 }
 0x254   : > { %v772_v11 = vpop.f32.mrf.mxu3 }
 0x267   : > { %911 = vrot.lane.b32.xlu1 %v848_v58, %s1664_s24  ;;  %s569_s24 = sand.u32 1, %s1649_s25  }
 0x268   : > { %s1314_s26 = sshll.u32 %s569_s24, 3  ;;  %s1210_s28 = scalar_lea.sflag [#allocation5], %s569_s24 }
 0x269   : > { %s571_s30 = scalar_lea.vmem [#allocation8], %s1314_s26  ;;  %s1607_s26 = scalar_lea.hbm %s2019_s17, 16 }
 0x26a   : > { %s1222_s18 = sshll.u32 %s571_s30, 4  ;;  %s1223_s18 = int_to_ptr.vmem [resolvable:$true] %s1222_s18 }
 0x2b7   : > { %v897_v12 = vpop.f32.mrf.mxu3 }
 0x2b8   : > { %v901_v20 = vsel %vm754_vm5, %v897_v12, -inf }
 0x2bd   : > { %v832_v13 = vpop.f32.mrf.mxu1 }
 0x2be   : > { %v836_v14 = vsel %vm754_vm5, %v832_v13, -inf }
 0x2bf   : > { %837 = vmax.xlane.f32.xlu2 %v836_v14  ;;  %v899_v15 = vpop.f32.mrf.mxu3  ;;  %v1498_v14 = vld [vmem:[%s2012_s10] ss:$0 sm:$0xff] }
 0x2c1   : > { %v776_v16 = vpop.xlane.xlu1 %775 }
 0x2c2   : > { %v777_v17 = vsub.f32 %v770_v7, %v776_v16  ;;  %v1412_v7 = vld [vmem:[%s2011_s9] sm:$0xff] }
 0x2c3   : > { %1029 = vmatpush.bf16.msra.mxu3 %v1412_v7 }
 0x2c4   : > { %v778_v18 = vmul.f32 1.442695, %v777_v17 }
 0x2c5   : > { %v834_v19 = vpop.f32.mrf.mxu1 }
 0x2c6   : > { %1507 = vpow2.f32 %v778_v18 }
 0x2c7   : > { %902 = vmax.xlane.f32.xlu2 %v901_v20 }
 0x2cc   : > { %v1508_v21 = vpop.eup %1507 }
 0x2cd   : > { %v959_v22 = vpop.f32.mrf.mxu1  ;;  %v783_v23 = vpack.c.bf16 %v1508_v21, %v1508_v21  ;;  %v780_v44 = vsel %vm754_vm5, %v1508_v21, 0.0 }
 0x2ce   : > { %v963_v24 = vsel %vm754_vm5, %v959_v22, -inf }
 0x2cf   : > { %964 = vmax.xlane.f32.xlu0 %v963_v24  ;;  %1344 = vmatmul.msk.bf16.vlgmr.msrb.gmra.mxu0 %vm754_vm5, %v783_v23 }
 0x2d5   : > { %v961_v25 = vpop.f32.mrf.mxu1 }
 0x2d6   : > { %v1415_v25 = vld [vmem:[#allocation6 + $0x8] sm:$0xff] }
 0x2d9   : > { %v912_v26 = vpop.permute.xlu1 %911 }
 0x2da   : > { %v917_v27 = vsel %vm787_vm6, %v912_v26, 0  ;;  %v1414_v26 = vld [vmem:[#allocation6] sm:$0xff] }
 0x2db   : > { %926 = vmatpush.bf16.msra.mxu0 %v917_v27 }
 0x2df   : > { %973 = vrot.lane.b32.xlu2 %v848_v58, %s1666_s19  ;;  %1091 = vmatpush.bf16.msrb.mxu0 %v1415_v25 }
 0x2e3   : > { %1092 = vmatpush.bf16.msrb.mxu0 %v1414_v26 }
 0x332   : > { %v838_v28 = vpop.xlane.xlu2 %837 }
 0x333   : > { %v839_v29 = vsub.f32 %v832_v13, %v838_v28 }
 0x335   : > { %v840_v30 = vmul.f32 1.442695, %v839_v29 }
 0x337   : > { %1509 = vpow2.f32 %v840_v30 }
 0x33a   : > { %v903_v31 = vpop.xlane.xlu2 %902 }
 0x33b   : > { %v904_v32 = vsub.f32 %v897_v12, %v903_v31 }
 0x33d   : > { %v1510_v33 = vpop.eup %1509  ;;  %v905_v34 = vmul.f32 1.442695, %v904_v32 }
 0x33e   : > { %v845_v35 = vpack.c.bf16 %v1510_v33, %v1510_v33  ;;  %v842_v36 = vsel %vm754_vm5, %v1510_v33, 0.0 }
 0x33f   : > { %1511 = vpow2.f32 %v905_v34  ;;  %843 = vadd.xlane.f32.xlu0 %v842_v36 }
 0x340   : > { %1346 = vmatmul.msk.bf16.vlgmr.msra.gmra.mxu2 %vm754_vm5, %v845_v35  ;;  %v1499_v35 = vld [vmem:[%s2013_s11] ss:$0 sm:$0xff] }
 0x342   : > { %v965_v37 = vpop.xlane.xlu0 %964  ;;  %v974_v38 = vpop.permute.xlu2 %973 }
 0x343   : > { %v966_v39 = vsub.f32 %v959_v22, %v965_v37  ;;  %v979_v40 = vsel %vm787_vm6, %v974_v38, 0 }
 0x344   : > { %988 = vmatpush.bf16.msrb.mxu2 %v979_v40 }
 0x345   : > { %v1512_v41 = vpop.eup %1511  ;;  %v967_v42 = vmul.f32 1.442695, %v966_v39 }
 0x346   : > { %v910_v43 = vpack.c.bf16 %v1512_v41, %v1512_v41  ;;  %v907_v45 = vsel %vm754_vm5, %v1512_v41, 0.0  ;;  %v1423_v41 = vld [vmem:[%s2017_s15 + $0x38] sm:$0xff] }
 0x347   : > { %1513 = vpow2.f32 %v967_v42  ;;  %781 = vadd.xlane.f32.xlu0 %v780_v44  ;;  %908 = vadd.xlane.f32.xlu2 %v907_v45  ;;  %v1422_v42 = vld [vmem:[%s2017_s15 + $0x30] sm:$0xff]  ;;  %v1421_v45 = vld [vmem:[%s2017_s15 + $0x28] sm:$0xff] }
 0x348   : > { %1348 = vmatmul.msk.bf16.vlgmr.msra.gmra.mxu0 %vm754_vm5, %v910_v43  ;;  %1194 = vmatpush.bf16.msra.mxu1 %v1423_v41  ;;  %v1501_v43 = vld [vmem:[%s2016_s14] ss:$0 sm:$0xff] }
 0x34c   : > { %v800_v46 = vpop.f32.mrf.mxu0  ;;  %1195 = vmatpush.bf16.msra.mxu1 %v1422_v42 }
 0x34d   : > { %v1514_v47 = vpop.eup %1513 }
 0x34e   : > { %v972_v48 = vpack.c.bf16 %v1514_v47, %v1514_v47  ;;  %v969_v49 = vsel %vm754_vm5, %v1514_v47, 0.0 }
 0x34f   : > { %970 = vadd.xlane.f32.xlu1 %v969_v49 }
 0x350   : > { %1350 = vmatmul.msk.bf16.vlgmr.msrb.gmra.mxu2 %vm754_vm5, %v972_v48  ;;  %1196 = vmatpush.bf16.msra.mxu1 %v1421_v45  ;;  %v1420_v48 = vld [vmem:[%s2017_s15 + $0x20] sm:$0xff] }
 0x354   : > { %v802_v50 = vpop.f32.mrf.mxu0  ;;  %1197 = vmatpush.bf16.msra.mxu1 %v1420_v48 }
 0x3b2   : > { %v844_v51 = vpop.xlane.xlu0 %843 }
 0x3ba   : > { %v782_v52 = vpop.xlane.xlu0 %781  ;;  %v909_v55 = vpop.xlane.xlu2 %908 }
 0x3bb   : > { %1515 = vrcp.f32 %v782_v52  ;;  %v1419_v52 = vld [vmem:[%s2017_s15 + $0x18] sm:$0xff] }
 0x3bc   : > { %1517 = vrcp.f32 %v844_v51  ;;  %1198 = vmatpush.bf16.msra.mxu1 %v1419_v52 }
 0x3bd   : > { %1519 = vrcp.f32 %v909_v55 }
 0x3c1   : > { %v1516_v53 = vpop.eup %1515 }
 0x3c2   : > { %v805_v54 = vmul.f32 %v1516_v53, %v800_v46  ;;  %v1518_v56 = vpop.eup %1517  ;;  %v971_v60 = vpop.xlane.xlu1 %970 }
 0x3c3   : > { %v866_v57 = vpop.f32.mrf.mxu2  ;;  %v1520_v61 = vpop.eup %1519  ;;  %1521 = vrcp.f32 %v971_v60 }
 0x3c4   : > { %806 = vst.msk [vmem:[#allocation2] sm:$0xff] %vm754_vm5, %v805_v54  ;;  %v871_v58 = vmul.f32 %v1518_v56, %v866_v57  ;;  %v1418_v57 = vld [vmem:[%s2017_s15 + $0x10] sm:$0xff] }
 0x3c5   : > { %v928_v59 = vpop.f32.mrf.mxu0  ;;  %1199 = vmatpush.bf16.msra.mxu1 %v1418_v57 }
 0x3c6   : > { %873 = vrot.lane.b32.xlu0 %v871_v58, %s1667_s20  ;;  %v933_v63 = vmul.f32 %v1520_v61, %v928_v59 }
 0x3c9   : > { %v1522_v2 = vpop.eup %1521 }
 0x3cb   : > { %v868_v62 = vpop.f32.mrf.mxu2 }
 0x3cc   : > { %v1417_v62 = vld [vmem:[%s2017_s15 + $0x8] sm:$0xff] }
 0x3cd   : > { %v930_v1 = vpop.f32.mrf.mxu0  ;;  %1200 = vmatpush.bf16.msra.mxu1 %v1417_v62 }
 0x3ce   : > { %935 = vrot.lane.b32.xlu0 %v933_v63, %s1668_s21 }
 0x3d3   : > { %v990_v3 = vpop.f32.mrf.mxu2 }
 0x3d4   : > { %v995_v4 = vmul.f32 %v1522_v2, %v990_v3  ;;  %v1416_v3 = vld [vmem:[%s2017_s15] sm:$0xff] }
 0x3d5   : > { %1201 = vmatpush.bf16.msra.mxu1 %v1416_v3 }
 0x3d6   : > { %997 = vrot.lane.b32.xlu0 %v995_v4, %s1669_s29  ;;  %s1220_s29 = scalar_lea.hbm %s2019_s17, %s1403_s27 }
 0x3d7   : > { %s1224_s22 = sshll.u32 %s1220_s29, 4  ;;  %s1225_s22 = int_to_ptr.hbm [resolvable:$true] %s1224_s22 }
 0x3d8   : > { %s1601_s23 = sshra.s32 %s1225_s22, 4  ;;  %s1602_s23 = int_to_ptr.hbm [resolvable:$true] %s1601_s23 }
 0x3d9   : > { %s1603_s0 = scalar_lea.hbm %s1602_s23, 8  ;;  %p1608_p3 = scmp.lt.s32.totalorder %s1602_s23, %s2019_s17 }
 0x3da   : > { %p1604_p0 = scmp.ne.s32.totalorder %s1602_s23, %s1603_s0  ;;  %p1609_p4 = scmp.lt.s32.totalorder %s1607_s26, %s1603_s0 }
 0x3db   : > { %v992_v5 = vpop.f32.mrf.mxu2 }
 0x3dc   : > { %p1605_p1 = pnand %p1604_p0, %p1798_p5  ;;  %p1610_p7 = por %p1609_p4, %p1608_p3 }
 0x3de   : > { %p1606_p2 = pneg %p1605_p1 }
 0x3e0   : > { %p1611_p8 = pnand %p1610_p7, %p1606_p2 }
 0x438   : > { %v874_v9 = vpop.permute.xlu0 %873 }
 0x439   : > { %877 = vst.msk [vmem:[#allocation2] sm:$0xff] %vm876_vm7, %v874_v9 }
 0x440   : > { %v936_v10 = vpop.permute.xlu0 %935 }
 0x441   : > { %939 = vst.msk [vmem:[#allocation2] sm:$0xff] %vm938_vm8, %v936_v10 }
 0x448   : > { %v998_v11 = vpop.permute.xlu0 %997 }
 0x449   : > { %1001 = vst.msk [vmem:[#allocation2] sm:$0xff] %vm1000_vm9, %v998_v11 }
 0x450   : > { %v1002_v12 = vld [vmem:[#allocation2] sm:$0xff] }
 0x451   : > { %v1003_v13 = vpack.c.bf16 %v1002_v12, %v1002_v12 }
 0x453   : > { %1359 = vmatmul.msk.bf16.vlgmr.msra.gmra.mxu3 %vm624_vm0, %v1003_v13 }
 0x4d6   : > { %v1031_v15 = vpop.f32.mrf.mxu3 }
 0x4d7   : > { %v1032_v16 = vadd.f32 %v1498_v14, %v1031_v15 }
 0x4d9   : > { %v1923_v17 = vadd.f32 %v1032_v16, %v1838_v0 }
 0x4db   : > { %v1036_v18 = vsel %vm624_vm0, %v1923_v17, 0.0 }
 0x4dc   : > { %1037 = vadd.xlane.f32.xlu2 %v1036_v18 }
 0x4de   : > { %v1033_v19 = vpop.f32.mrf.mxu3 }
 0x54f   : > { %v1038_v20 = vpop.xlane.xlu2 %1037 }
 0x550   : > { %v1039_v21 = vmul.f32 %v1038_v20, %v1842_v8 }
 0x552   : > { %v1040_v22 = vsub.f32 %v1923_v17, %v1039_v21 }
 0x554   : > { %v1041_v23 = vmul.f32 %v1040_v22, %v1040_v22 }
 0x556   : > { %v1042_v24 = vsel %vm624_vm0, %v1041_v23, 0.0 }
 0x557   : > { %1043 = vadd.xlane.f32.xlu1 %v1042_v24 }
 0x5ca   : > { %v1044_v0 = vpop.xlane.xlu1 %1043 }
 0x5cb   : > { %v1045_v27 = vmul.f32 %v1044_v0, %v1842_v8  ;;  %v1500_v8 = vld [vmem:[%s2014_s12] ss:$0 sm:$0xff] }
 0x5cd   : > { %v1046_v28 = vadd.f32 1e-05, %v1045_v27 }
 0x5cf   : > { %1523 = vrsqrt.f32 %v1046_v28  ;;  %vm1053_vm11 = vweird.f32 %v1046_v28 }
 0x5d5   : > { %v1524_v29 = vpop.eup %1523 }
 0x5d6   : > { %v1048_v30 = vmul.f32 %v1524_v29, %v1046_v28  ;;  %vm1054_vm10 = vweird.f32 %v1524_v29 }
 0x5d7   : > { %vm1055_vm12 = vmor %vm1053_vm11, %vm1054_vm10 }
 0x5d8   : > { %v1049_v31 = vmul.f32 %v1524_v29, %v1048_v30 }
 0x5da   : > { %v1050_v32 = vmul.f32 0.5, %v1049_v31  ;;  %v1502_v31 = vld [vmem:[%s2018_s16] ss:$0 sm:$0xff] }
 0x5dc   : > { %v1051_v33 = vsub.f32 1.5, %v1050_v32 }
 0x5de   : > { %v1052_v34 = vmul.f32 %v1524_v29, %v1051_v33 }
 0x5e0   : > { %v1056_v36 = vsel %vm1055_vm12, %v1524_v29, %v1052_v34 }
 0x5e1   : > { %v1057_v37 = vmul.f32 %v1056_v36, %v1040_v22 }
 0x5e3   : > { %v1061_v38 = vmul.f32 %v1499_v35, %v1057_v37 }
 0x5e5   : > { %v1065_v39 = vadd.f32 %v1500_v8, %v1061_v38 }
 0x5e7   : > { %v1066_v40 = vpack.c.bf16 %v1065_v39, %v1065_v39 }
 0x5e9   : > { %1368 = vmatmul.msk.bf16.vlgmr.msrb.gmra.mxu0 %vm624_vm0, %v1066_v40 }
 0x666   : > { %v1094_v44 = vpop.f32.mrf.mxu0 }
 0x667   : > { %v1095_v46 = vadd.f32 %v1501_v43, %v1094_v44 }
 0x669   : > { %v1099_v47 = vmul.f32 0.70710677, %v1095_v46  ;;  %v1098_v27 = vmul.f32 0.5, %v1095_v46 }
 0x66b   : > { %v1100_v49 = vmul.f32 %v1099_v47, %v1099_v47 }
 0x66d   : > { %v1101_v50 = vmin.f32 %v1100_v49, 16.0 }
 0x66e   : > { %v1096_v51 = vpop.f32.mrf.mxu0 }
 0x66f   : > { %v1102_v53 = vmul.f32 2.1237322e-06, %v1101_v50  ;;  %v1113_v54 = vmul.f32 3.8918573e-05, %v1101_v50 }
 0x671   : > { %v1103_v55 = vadd.f32 0.00028619796, %v1102_v53  ;;  %v1114_v56 = vadd.f32 0.001143296, %v1113_v54 }
 0x673   : > { %v1104_v58 = vmul.f32 %v1103_v55, %v1101_v50  ;;  %v1115_v59 = vmul.f32 %v1114_v56, %v1101_v50 }
 0x675   : > { %v1116_v60 = vadd.f32 0.014752088, %v1115_v59  ;;  %v1105_v61 = vadd.f32 0.0036580483, %v1104_v58 }
 0x677   : > { %v1117_v63 = vmul.f32 %v1116_v60, %v1101_v50  ;;  %v1106_v2 = vmul.f32 %v1105_v61, %v1101_v50 }
 0x679   : > { %v1118_v1 = vadd.f32 0.112945676, %v1117_v63  ;;  %v1107_v6 = vadd.f32 0.05243302, %v1106_v2 }
 0x67b   : > { %v1119_v4 = vmul.f32 %v1118_v1, %v1101_v50  ;;  %v1108_v10 = vmul.f32 %v1107_v6, %v1101_v50 }
 0x67d   : > { %v1120_v5 = vadd.f32 0.4994258, %v1119_v4  ;;  %v1109_v11 = vadd.f32 0.18741608, %v1108_v10 }
 0x67f   : > { %v1121_v7 = vmul.f32 %v1120_v5, %v1101_v50  ;;  %v1110_v13 = vmul.f32 %v1109_v11, %v1101_v50 }
 0x681   : > { %v1122_v9 = vadd.f32 1.0, %v1121_v7  ;;  %v1111_v18 = vadd.f32 1.1283791, %v1110_v13 }
 0x683   : > { %1525 = vrcp.f32 %v1122_v9  ;;  %v1134_v16 = vand.u32 2147483648, %v1122_v9  ;;  %v1132_v20 = vand.u32 2147483647, %v1122_v9  ;;  %vm1128_vm14 = vweird.f32 %v1122_v9 }
 0x684   : > { %v1112_v23 = vmul.f32 %v1111_v18, %v1099_v47 }
 0x685   : > { %v1135_v22 = vor.u32 1.1754944e-38, %v1134_v16  ;;  %vm1133_vm1 = vcmp.eq.f32.partialorder %v1132_v20, 8.507059e+37 }
 0x689   : > { %v1526_v12 = vpop.eup %1525 }
 0x68a   : > { %v1124_v14 = vmul.f32 %v1526_v12, %v1122_v9  ;;  %vm1129_vm13 = vweird.f32 %v1526_v12 }
 0x68b   : > { %vm1130_vm15 = vmor %vm1128_vm14, %vm1129_vm13 }
 0x68c   : > { %v1125_v15 = vsub.f32 1.0, %v1124_v14 }
 0x68e   : > { %v1126_v19 = vmul.f32 %v1526_v12, %v1125_v15 }
 0x690   : > { %v1127_v21 = vadd.f32 %v1526_v12, %v1126_v19 }
 0x692   : > { %v1131_v24 = vsel %vm1130_vm15, %v1526_v12, %v1127_v21 }
 0x693   : > { %v1136_v25 = vsel %vm1133_vm1, %v1135_v22, %v1131_v24 }
 0x694   : > { %v1137_v26 = vmul.f32 %v1136_v25, %v1112_v23 }
 0x696   : > { %v1369_v0 = vclamps-f32 %v1137_v26, 1.0 }
 0x698   : > { %v1140_v28 = vadd.f32 1.0, %v1369_v0 }
 0x69a   : > { %v1141_v29 = vmul.f32 %v1140_v28, %v1098_v27 }
 0x69c   : > { %v1142_v30 = vpack.c.bf16 %v1141_v29, %v1141_v29 }
 0x69e   : > { %1202 = vmatmul.bf16.vlgmr.msra.gmra.mxu1 %v1142_v30 }
 0x71b   : > { %v1203_v32 = vpop.f32.mrf.mxu1 }
 0x71c   : > { %v1204_v33 = vadd.f32 %v1502_v31, %v1203_v32 }
 0x71e   : > { %v1207_v34 = vadd.f32 %v1204_v33, %v1923_v17 }
 0x720   : > { %1208 = vst.msk [vmem:[%s571_s30] sm:$0xff] %vm624_vm0, %v1207_v34 }
 0x721   : > { %1614 = shalt.err (!%p1611_p8)
}
 0x722   : > { %1432 = dma.vmem_to_hbm [thread:$0]  (%p1798_p5), %s1223_s18, 128, %s1225_s22, %s1210_s28  }
 0x723   : > { %v1205_v17 = vpop.f32.mrf.mxu1 }
 0x724 PF: > { %s2041_s24 = sld [smem:[#allocation14_spill]] }
 0x725   : > { %s2042_s29 = sld [smem:[#allocation12_spill]] }
 0x72a   : > { %p1449_p9 = scmp.ge.s32.totalorder %s2041_s24, 2 }
 0x72b   : > { %s1236_s2 = sand.u32 1, %s2042_s29  }
 0x72c   : > { %p1442_p10 = pnand %p1449_p9, %p1802_p6  ;;  %s1237_s27 = scalar_lea.sflag [#allocation5], %s1236_s2 }
 0x72e   : > { %p1443_p11 = pneg %p1442_p10 }
 0x730   : > { %1640 = dma.done.wait (%p1443_p11), %s1237_s27, 128  }
 0x731   : > { %1642 = vsyncadd (%p1443_p11), %s1237_s27, 4294967168  ;;  %s2044_s27 = sld [smem:[#allocation15_spill]]  ;;  %s2047_s24 = smov %s1649_s25 }
 0x732   : > { %s2045_s23 = sld [smem:[#allocation13_spill]] }
 0x733   : > { %s2046_s26 = sld [smem:[#allocation16_spill]] }
 0x737   : > { %p29_p12 = scmp.ge.s32.totalorder %s2044_s27, 4  }
 0x738   : > { %s2048_s25 = smov %s2045_s23 }
 0x739   :  { %31 = sbr.rel (!%p29_p12) target bundleno = 9 (0x9), region = 132 }
 0x73e   :  { %1243 = vsyncpa [#allocation4], 1 }
 0x73f   :  { %1245 = vsyncpa [#allocation4 + $0x1], 1 }
 0x740   :  { %1246 = vsyncpa [#allocation7], 1 }
 0x741   :  { %1247 = vsyncpa [#allocation5], 1 }
 0x742   :  { %1249 = vsyncpa [#allocation5 + $0x1], 1 }

</bundles_post_ra>
